<compile_context>
chip_gen: v7x
topology: tpu7x:2x2x1
jax: 0.10.0
libtpu: 0.0.40
codegen_flags: <defaults>
</compile_context>

<pallas_src>
import functools

import jax
import jax.numpy as jnp
from jax import lax
from jax.experimental import pallas as pl
from jax.experimental.pallas import tpu as pltpu

_TC = 256  # in-kernel column (batch-lane) chunk; multiple of 128


def _round_up(n, m):
    return ((n + m - 1) // m) * m


def _cdiv(a, b):
    return -(-a // b)


def _dqn_kernel(x_ref, w1_ref, b1_ref, w2_ref, b2_ref, w3_ref, b3_ref, o_ref,
                *, nc, tc):
    # Resident params (loaded once per grid step).
    w1 = w1_ref[...]        # [64, 2]   f32
    b1 = b1_ref[...]        # [64, 1]   f32
    w2 = w2_ref[...]        # [128, 64] bf16
    b2 = b2_ref[...]        # [128, 1]  f32
    w3 = w3_ref[...]        # [2, 128]  bf16
    b3 = b3_ref[...]        # [2, 1]    f32

    def chunk(c, carry):
        col = pl.multiple_of(c * tc, tc)
        x = x_ref[:, pl.ds(col, tc)]                    # [2, tc]

        # fc1 on the VPU (K=2 is too shallow for the MXU): two broadcast
        # multiply-adds + bias, then ReLU.  Kept in f32 (v5e VPU has no bf16).
        h1 = (w1[:, 0:1] * x[0:1, :]
              + w1[:, 1:2] * x[1:2, :]
              + b1)                                     # [64, tc]
        h1 = jnp.maximum(h1, 0.0)

        # fc2 + ReLU on the MXU, bf16 operands / f32 accumulation.
        h2 = jnp.dot(w2, h1.astype(jnp.bfloat16),
                     preferred_element_type=jnp.float32) + b2   # [128, tc]
        h2 = jnp.maximum(h2, 0.0)

        # fc3 (no activation).
        out = jnp.dot(w3, h2.astype(jnp.bfloat16),
                      preferred_element_type=jnp.float32) + b3  # [2, tc]
        o_ref[:, pl.ds(col, tc)] = out.astype(o_ref.dtype)
        return carry

    lax.fori_loop(0, nc, chunk, 0, unroll=True)


def _pick_tiles(batch, tb_max):
    """Choose (TB, padded_batch, grid_b).  TB is a multiple of _TC."""
    bp_min = _round_up(max(batch, 1), _TC)
    n_chunks = bp_min // _TC
    if n_chunks >= 2:
        # At least 2 grid tiles so both v7x TensorCores get work; cap the tile
        # at tb_max to bound VMEM / keep pipelining depth.
        n_tiles = max(2, _cdiv(bp_min, tb_max))
        tb = _cdiv(n_chunks, n_tiles) * _TC
    else:
        tb = _TC
    bp = _round_up(batch, tb)
    return tb, bp, bp // tb


@functools.partial(jax.jit, static_argnames=("tb_max",))
def dqn_forward(x, params, *, tb_max=4096):
    """x: [B, 2] float32; params: dict (PyTorch-layout weights). Returns [B, 2]."""
    w1, b1 = params["w1"], params["b1"]
    w2, b2 = params["w2"].astype(jnp.bfloat16), params["b2"]
    w3, b3 = params["w3"].astype(jnp.bfloat16), params["b3"]

    B = x.shape[0]
    TB, Bp, grid_b = _pick_tiles(B, tb_max)

    # Lane-dense layout: batch on the last (lane) axis.
    xt = x.T                                            # [2, B]
    if Bp != B:
        xt = jnp.pad(xt, ((0, 0), (0, Bp - B)))         # [2, Bp]

    kernel = functools.partial(_dqn_kernel, nc=TB // _TC, tc=_TC)

    def resident(a):
        # Weights / biases: one full-extent block, resident across grid steps.
        return pl.BlockSpec(a.shape, lambda i: (0, 0))

    out_t = pl.pallas_call(
        kernel,
        out_shape=jax.ShapeDtypeStruct((2, Bp), jnp.float32),
        grid=(grid_b,),
        in_specs=[
            pl.BlockSpec((2, TB), lambda i: (0, i)),    # x tile (batch on lanes)
            resident(w1), resident(b1),
            resident(w2), resident(b2),
            resident(w3), resident(b3),
        ],
        out_specs=pl.BlockSpec((2, TB), lambda i: (0, i)),
        compiler_params=pltpu.CompilerParams(
            dimension_semantics=("parallel",),          # megacore on v7x
        ),
    )(xt, w1, b1, w2, b2, w3, b3)

    return out_t[:, :B].T                               # [B, 2]


def init_params(key):
    """Deterministic init; PyTorch nn.Linear layout.

    Weights are [out, in] (PyTorch-native); biases are [out, 1] so they
    broadcast along the lane (batch) axis inside the kernel.
    """
    k1, k2, k3, k4, k5, k6 = jax.random.split(key, 6)

    def uinit(k, shape, fan_in):
        bound = 1.0 / jnp.sqrt(float(fan_in))
        return jax.random.uniform(k, shape, jnp.float32, -bound, bound)

    return {
        "w1": uinit(k1, (64, 2), 2),
        "b1": uinit(k2, (64, 1), 2),
        "w2": uinit(k3, (128, 64), 64),
        "b2": uinit(k4, (128, 1), 64),
        "w3": uinit(k5, (2, 128), 128),
        "b3": uinit(k6, (2, 1), 128),
    }


def dqn_reference(x, params):
    h1 = jnp.maximum(x @ params["w1"].T + params["b1"].T, 0.0)
    h2 = jnp.maximum(h1 @ params["w2"].T + params["b2"].T, 0.0)
    return h2 @ params["w3"].T + params["b3"].T


if __name__ == "__main__":
    key = jax.random.PRNGKey(0)
    pkey, xkey, xkey2 = jax.random.split(key, 3)
    params = init_params(pkey)

    # bf16 MXU operands for fc2/fc3 -> compare vs f32 reference with relaxed tol.
    tol = dict(atol=3e-2, rtol=3e-2)

    # Small-batch case (single tile, single chunk).
    batch = 8
    x = jax.random.normal(xkey, (batch, 2), dtype=jnp.float32)
    out = jax.block_until_ready(dqn_forward(x, params))
    ref = dqn_reference(x, params)
    assert out.shape == (batch, 2), out.shape
    assert jnp.allclose(out, ref, **tol), "Pallas output mismatch (batch=8)"

    # Larger batch exercising multi-tile grid + in-kernel chunk loop + padding.
    batch2 = 600
    x2 = jax.random.normal(xkey2, (batch2, 2), dtype=jnp.float32)
    out2 = jax.block_until_ready(dqn_forward(x2, params))
    ref2 = dqn_reference(x2, params)
    assert out2.shape == (batch2, 2), out2.shape
    assert jnp.allclose(out2, ref2, **tol), "Pallas output mismatch (batch=600)"

    print("KERNEL_OK")
</pallas_src>

<mosaic_0001>
module attributes {stable_mosaic.version = 11 : i64} {
  func.func @_dqn_kernel(%arg0: i32, %arg1: memref<2x256xf32, #tpu.memory_space<vmem>>, %arg2: memref<64x2xf32, #tpu.memory_space<vmem>>, %arg3: memref<64x1xf32, #tpu.memory_space<vmem>>, %arg4: memref<128x64xbf16, #tpu.memory_space<vmem>>, %arg5: memref<128x1xf32, #tpu.memory_space<vmem>>, %arg6: memref<2x128xbf16, #tpu.memory_space<vmem>>, %arg7: memref<2x1xf32, #tpu.memory_space<vmem>>, %arg8: memref<2x256xf32, #tpu.memory_space<vmem>>) attributes {dimension_semantics = [#tpu.dimension_semantics<parallel>], iteration_bounds = array<i64: 1>, scalar_prefetch = 0 : i64, scratch_operands = 0 : i64, tpu.core_type = #tpu.core_type<tc>, window_params = [{transform_indices = @transform_0, window_bounds = array<i64: 2, 256>}, {pipeline_mode = #tpu.pipeline_mode<synchronous>, transform_indices = @transform_1, window_bounds = array<i64: 64, 2>}, {pipeline_mode = #tpu.pipeline_mode<synchronous>, transform_indices = @transform_2, window_bounds = array<i64: 64, 1>}, {pipeline_mode = #tpu.pipeline_mode<synchronous>, transform_indices = @transform_3, window_bounds = array<i64: 128, 64>}, {pipeline_mode = #tpu.pipeline_mode<synchronous>, transform_indices = @transform_4, window_bounds = array<i64: 128, 1>}, {pipeline_mode = #tpu.pipeline_mode<synchronous>, transform_indices = @transform_5, window_bounds = array<i64: 2, 128>}, {pipeline_mode = #tpu.pipeline_mode<synchronous>, transform_indices = @transform_6, window_bounds = array<i64: 2, 1>}, {transform_indices = @transform_7, window_bounds = array<i64: 2, 256>}]} {
    %c0 = arith.constant 0 : index
    %c0_0 = arith.constant 0 : index
    %0 = vector.load %arg2[%c0, %c0_0] : memref<64x2xf32, #tpu.memory_space<vmem>>, vector<64x2xf32>
    %c0_1 = arith.constant 0 : index
    %c0_2 = arith.constant 0 : index
    %1 = vector.load %arg3[%c0_1, %c0_2] : memref<64x1xf32, #tpu.memory_space<vmem>>, vector<64x1xf32>
    %c0_3 = arith.constant 0 : index
    %c0_4 = arith.constant 0 : index
    %2 = vector.load %arg4[%c0_3, %c0_4] : memref<128x64xbf16, #tpu.memory_space<vmem>>, vector<128x64xbf16>
    %c0_5 = arith.constant 0 : index
    %c0_6 = arith.constant 0 : index
    %3 = vector.load %arg5[%c0_5, %c0_6] : memref<128x1xf32, #tpu.memory_space<vmem>>, vector<128x1xf32>
    %c0_7 = arith.constant 0 : index
    %c0_8 = arith.constant 0 : index
    %4 = vector.load %arg6[%c0_7, %c0_8] : memref<2x128xbf16, #tpu.memory_space<vmem>>, vector<2x128xbf16>
    %c0_9 = arith.constant 0 : index
    %c0_10 = arith.constant 0 : index
    %5 = vector.load %arg7[%c0_9, %c0_10] : memref<2x1xf32, #tpu.memory_space<vmem>>, vector<2x1xf32>
    %c0_i32 = arith.constant 0 : i32
    %c256_i32 = arith.constant 256 : i32
    %6 = arith.muli %c0_i32, %c256_i32 : i32
    %7 = tpu.assume_multiple %6, 256 : i32
    %c0_11 = arith.constant 0 : index
    %8 = arith.index_cast %7 : i32 to index
    %9 = vector.load %arg1[%c0_11, %8] : memref<2x256xf32, #tpu.memory_space<vmem>>, vector<2x256xf32>
    %10 = vector.extract_strided_slice %0 {offsets = [0, 0], sizes = [64, 1], strides = [1, 1]} : vector<64x2xf32> to vector<64x1xf32>
    %11 = vector.extract_strided_slice %9 {offsets = [0, 0], sizes = [1, 256], strides = [1, 1]} : vector<2x256xf32> to vector<1x256xf32>
    %12 = vector.broadcast %10 : vector<64x1xf32> to vector<64x256xf32>
    %13 = vector.broadcast %11 : vector<1x256xf32> to vector<64x256xf32>
    %14 = arith.mulf %12, %13 : vector<64x256xf32>
    %15 = vector.extract_strided_slice %0 {offsets = [0, 1], sizes = [64, 1], strides = [1, 1]} : vector<64x2xf32> to vector<64x1xf32>
    %16 = vector.extract_strided_slice %9 {offsets = [1, 0], sizes = [1, 256], strides = [1, 1]} : vector<2x256xf32> to vector<1x256xf32>
    %17 = vector.broadcast %15 : vector<64x1xf32> to vector<64x256xf32>
    %18 = vector.broadcast %16 : vector<1x256xf32> to vector<64x256xf32>
    %19 = arith.mulf %17, %18 : vector<64x256xf32>
    %20 = arith.addf %14, %19 : vector<64x256xf32>
    %21 = vector.broadcast %1 : vector<64x1xf32> to vector<64x256xf32>
    %22 = arith.addf %20, %21 : vector<64x256xf32>
    %cst = arith.constant 0.000000e+00 : f32
    %23 = vector.broadcast %cst : f32 to vector<64x256xf32>
    %24 = arith.maximumf %22, %23 : vector<64x256xf32>
    %25 = arith.truncf %24 : vector<64x256xf32> to vector<64x256xbf16>
    %cst_12 = arith.constant dense<0.000000e+00> : vector<128x256xf32>
    %26 = tpu.matmul %2, %25, %cst_12 {dimension_numbers = #tpu.dot_dimension_numbers<[1], [0], [0], [1], [0, 0, 1, 1], [], []>} : vector<128x64xbf16>, vector<64x256xbf16>, vector<128x256xf32> -> vector<128x256xf32>
    %27 = vector.broadcast %3 : vector<128x1xf32> to vector<128x256xf32>
    %28 = arith.addf %26, %27 : vector<128x256xf32>
    %cst_13 = arith.constant 0.000000e+00 : f32
    %29 = vector.broadcast %cst_13 : f32 to vector<128x256xf32>
    %30 = arith.maximumf %28, %29 : vector<128x256xf32>
    %31 = arith.truncf %30 : vector<128x256xf32> to vector<128x256xbf16>
    %cst_14 = arith.constant dense<0.000000e+00> : vector<2x256xf32>
    %32 = tpu.matmul %4, %31, %cst_14 {dimension_numbers = #tpu.dot_dimension_numbers<[1], [0], [0], [1], [0, 0, 1, 1], [], []>} : vector<2x128xbf16>, vector<128x256xbf16>, vector<2x256xf32> -> vector<2x256xf32>
    %33 = vector.broadcast %5 : vector<2x1xf32> to vector<2x256xf32>
    %34 = arith.addf %32, %33 : vector<2x256xf32>
    %c0_15 = arith.constant 0 : index
    %35 = arith.index_cast %7 : i32 to index
    %36 = vector.load %arg8[%c0_15, %35] : memref<2x256xf32, #tpu.memory_space<vmem>>, vector<2x256xf32>
    tpu.vector_store %arg8[%c0_15, %35], %34 {strides = array<i32>} : memref<2x256xf32, #tpu.memory_space<vmem>>, vector<2x256xf32>,
    %c1_i32 = arith.constant 1 : i32
    return
  }
  func.func @transform_0(%arg0: i32) -> (i32, i32) {
    %c0_i32 = arith.constant 0 : i32
    %c0_i32_0 = arith.constant 0 : i32
    return %c0_i32, %arg0 : i32, i32
  }
  func.func @transform_1(%arg0: i32) -> (i32, i32) {
    %c0_i32 = arith.constant 0 : i32
    %c0_i32_0 = arith.constant 0 : i32
    %c0_i32_1 = arith.constant 0 : i32
    return %c0_i32, %c0_i32_0 : i32, i32
  }
  func.func @transform_2(%arg0: i32) -> (i32, i32) {
    %c0_i32 = arith.constant 0 : i32
    %c0_i32_0 = arith.constant 0 : i32
    %c0_i32_1 = arith.constant 0 : i32
    return %c0_i32, %c0_i32_0 : i32, i32
  }
  func.func @transform_3(%arg0: i32) -> (i32, i32) {
    %c0_i32 = arith.constant 0 : i32
    %c0_i32_0 = arith.constant 0 : i32
    %c0_i32_1 = arith.constant 0 : i32
    return %c0_i32, %c0_i32_0 : i32, i32
  }
  func.func @transform_4(%arg0: i32) -> (i32, i32) {
    %c0_i32 = arith.constant 0 : i32
    %c0_i32_0 = arith.constant 0 : i32
    %c0_i32_1 = arith.constant 0 : i32
    return %c0_i32, %c0_i32_0 : i32, i32
  }
  func.func @transform_5(%arg0: i32) -> (i32, i32) {
    %c0_i32 = arith.constant 0 : i32
    %c0_i32_0 = arith.constant 0 : i32
    %c0_i32_1 = arith.constant 0 : i32
    return %c0_i32, %c0_i32_0 : i32, i32
  }
  func.func @transform_6(%arg0: i32) -> (i32, i32) {
    %c0_i32 = arith.constant 0 : i32
    %c0_i32_0 = arith.constant 0 : i32
    %c0_i32_1 = arith.constant 0 : i32
    return %c0_i32, %c0_i32_0 : i32, i32
  }
  func.func @transform_7(%arg0: i32) -> (i32, i32) {
    %c0_i32 = arith.constant 0 : i32
    %c0_i32_0 = arith.constant 0 : i32
    return %c0_i32, %arg0 : i32, i32
  }
}

</mosaic_0001>

<bundles_post_ra>
// kernel: dqn_forward.1
= control target key start
LH: loop header
LB: loop body
LE: loop exit
PB: predicated region body
PF: predicated region fallthrough
CT: control target
= control target key end

     0   :  { %v720_v0 = vmov 1   ;;  %v721_v5 = vmov 0   ;;  %v119_v35 = vlaneseq  ;;  %vm435_vm0 = vcmask 523264   ;;  %s964_s1 = inlined_call_operand.vmem [shape: f32[64,2], index: 1, kind: input, shape index: {}]   ;;  %s965_s2 = inlined_call_operand.vmem [shape: f32[64,1], index: 2, kind: input, shape index: {}]   ;;  %s966_s4 = inlined_call_operand.vmem [shape: f32[128,1], index: 4, kind: input, shape index: {}]   ;;  %s967_s6 = inlined_call_operand.vmem [shape: f32[2,1], index: 6, kind: input, shape index: {}]   ;;  %s968_s3 = inlined_call_operand.vmem [shape: bf16[128,64], index: 3, kind: input, shape index: {}]   ;;  %s969_s0 = inlined_call_operand.vmem [shape: f32[2,256], index: 0, kind: input, shape index: {}]   ;;  %s970_s5 = inlined_call_operand.vmem [shape: bf16[2,128], index: 5, kind: input, shape index: {}]   ;;  %s971_s7 = inlined_call_operand.vmem [shape: f32[2,256], index: 7, kind: output, shape index: {}]  }
   0x1   :  { %704 = vset.pattern.permute.xlu0 %v720_v0  ;;  %702 = vset.pattern.permute.xlu1 %v720_v0  ;;  %v29_v1 = vld [vmem:[%s964_s1 + $0x10] sm:$0xff]  ;;  %v27_v2 = vld [vmem:[%s964_s1] sm:$0xff]  ;;  %v28_v4 = vld [vmem:[%s964_s1 + $0x8] sm:$0xff] }
   0x2   :  { %162 = vperm.xlu0 %704, %v29_v1   ;;  %154 = vperm.xlu1 %702, %v27_v2   ;;  %v31_v3 = vld [vmem:[%s964_s1 + $0x20] sm:$0xff]  ;;  %v33_v6 = vld [vmem:[%s964_s1 + $0x30] sm:$0xff]  ;;  %v30_v7 = vld [vmem:[%s964_s1 + $0x18] sm:$0xff]  ;;  %v120_v38 = vshrl.u32 %v119_v35, 7 }
   0x3   :  { %492 = vmatprep.mubr.bf16.mxu0 %v721_v5  ;;  %658 = vmatprep.mubr.bf16.mxu1 %v721_v5  ;;  %v35_v8 = vld [vmem:[%s965_s2] sm:$0xff]  ;;  %v36_v9 = vld [vmem:[%s965_s2 + $0x8] sm:$0xff]  ;;  %v38_v11 = vld [vmem:[%s965_s2 + $0x18] sm:$0xff] }
   0x4   :  { %v32_v10 = vld [vmem:[%s964_s1 + $0x28] sm:$0xff]  ;;  %v59_v13 = vld [vmem:[%s966_s4] sm:$0xff]  ;;  %v37_v14 = vld [vmem:[%s965_s2 + $0x10] sm:$0xff]  ;;  %v187_v41 = vsub.s32 1, %v120_v38  ;;  %v191_v42 = vsub.s32 3, %v120_v38  ;;  %v121_v44 = vsub.s32 0, %v120_v38 }
   0x5   :  { %v40_v12 = vld [vmem:[%s965_s2 + $0x28] sm:$0xff]  ;;  %v61_v15 = vld [vmem:[%s966_s4 + $0x10] sm:$0xff]  ;;  %v63_v16 = vld [vmem:[%s966_s4 + $0x20] sm:$0xff]  ;;  %v125_v45 = vsub.s32 2, %v120_v38 }
   0x6   :  { %170 = vperm.xlu0 %704, %v31_v3   ;;  %158 = vperm.xlu1 %702, %v28_v4   ;;  %v34_v17 = vld [vmem:[%s964_s1 + $0x38] sm:$0xff]  ;;  %v65_v18 = vld [vmem:[%s966_s4 + $0x30] sm:$0xff]  ;;  %v67_v19 = vld [vmem:[%s966_s4 + $0x40] sm:$0xff] }
   0x7   :  { %v39_v20 = vld [vmem:[%s965_s2 + $0x20] sm:$0xff]  ;;  %v69_v21 = vld [vmem:[%s966_s4 + $0x50] sm:$0xff]  ;;  %v42_v24 = vld [vmem:[%s965_s2 + $0x38] sm:$0xff] }
   0x8   :  { %v41_v22 = vld [vmem:[%s965_s2 + $0x30] sm:$0xff]  ;;  %v71_v23 = vld [vmem:[%s966_s4 + $0x60] sm:$0xff]  ;;  %v60_v26 = vld [vmem:[%s966_s4 + $0x8] sm:$0xff] }
   0x9   :  { %v73_v25 = vld [vmem:[%s966_s4 + $0x70] sm:$0xff]  ;;  %v76_v27 = vld [vmem:[%s967_s6] sm:$0x3]  ;;  %v62_v28 = vld [vmem:[%s966_s4 + $0x18] sm:$0xff] }
   0xa   :  { %178 = vperm.xlu0 %704, %v33_v6   ;;  %703 = vset.pattern.permute.xlu1 %v721_v5  ;;  %v64_v29 = vld [vmem:[%s966_s4 + $0x28] sm:$0xff]  ;;  %v66_v30 = vld [vmem:[%s966_s4 + $0x38] sm:$0xff]  ;;  %v77_v46 = vld [vmem:[%s969_s0] sm:$0xf] }
   0xb   :  { %95 = vperm.xlu1 %703, %v30_v7   ;;  %v68_v31 = vld [vmem:[%s966_s4 + $0x48] sm:$0xff]  ;;  %v70_v32 = vld [vmem:[%s966_s4 + $0x58] sm:$0xff]  ;;  %v188_v48 = vrot.slane %v77_v46, %v187_v41  ;;  %v192_v49 = vrot.slane %v77_v46, %v191_v42  ;;  %v122_v50 = vrot.slane %v77_v46, %v121_v44  ;;  %v126_v51 = vrot.slane %v77_v46, %v125_v45 }
   0xc   :  { %v72_v33 = vld [vmem:[%s966_s4 + $0x68] sm:$0xff]  ;;  %v74_v34 = vld [vmem:[%s966_s4 + $0x78] sm:$0xff] }
   0xd   :  { %v875_v54 = vrot.slane %v188_v48, %v187_v41  ;;  %v877_v55 = vrot.slane %v192_v49, %v187_v41  ;;  %v879_v56 = vrot.slane %v122_v50, %v121_v44  ;;  %v881_v57 = vrot.slane %v126_v51, %v121_v44 }
   0xe   :  { %709 = vset.pattern.permute.xlu0 %v721_v5 }
   0xf   :  { %80 = vperm.xlu0 %709, %v27_v2   ;;  %705 = vset.pattern.permute.xlu1 %v720_v0 }
  0x10   :  { %166 = vperm.xlu1 %705, %v30_v7  }
  0x13   :  { %85 = vperm.xlu0 %709, %v28_v4  }
  0x14   :  { %706 = vset.pattern.permute.xlu1 %v721_v5 }
  0x15   :  { %237 = vperm.xlu1 %706, %v35_v8  }
  0x17   :  { %90 = vperm.xlu0 %709, %v29_v1  }
  0x19   :  { %100 = vperm.xlu1 %706, %v31_v3  }
  0x1b   :  { %242 = vperm.xlu0 %709, %v36_v9  }
  0x1d   :  { %105 = vperm.xlu1 %706, %v32_v10  }
  0x1f   :  { %252 = vperm.xlu0 %709, %v38_v11  }
  0x21   :  { %707 = vset.pattern.permute.xlu1 %v720_v0 }
  0x22   :  { %174 = vperm.xlu1 %707, %v32_v10  }
  0x23   :  { %262 = vperm.xlu0 %709, %v40_v12  }
  0x26   :  { %708 = vset.pattern.permute.xlu1 %v721_v5 }
  0x27   :  { %317 = vperm.xlu0 %709, %v59_v13   ;;  %247 = vperm.xlu1 %708, %v37_v14  }
  0x2b   :  { %327 = vperm.xlu0 %709, %v61_v15   ;;  %110 = vperm.xlu1 %708, %v33_v6  }
  0x2f   :  { %337 = vperm.xlu0 %709, %v63_v16   ;;  %115 = vperm.xlu1 %708, %v34_v17  }
  0x33   :  { %347 = vperm.xlu0 %709, %v65_v18   ;;  %710 = vset.pattern.permute.xlu1 %v720_v0 }
  0x34   :  { %182 = vperm.xlu1 %710, %v34_v17  }
  0x37   :  { %357 = vperm.xlu0 %709, %v67_v19  }
  0x38   :  { %711 = vset.pattern.permute.xlu1 %v721_v5 }
  0x39   :  { %257 = vperm.xlu1 %711, %v39_v20  }
  0x3b   :  { %367 = vperm.xlu0 %709, %v69_v21  }
  0x3d   :  { %267 = vperm.xlu1 %711, %v41_v22  }
  0x3f   :  { %377 = vperm.xlu0 %709, %v71_v23  }
  0x41   :  { %272 = vperm.xlu1 %711, %v42_v24  }
  0x43   :  { %387 = vperm.xlu0 %709, %v73_v25  }
  0x45   :  { %322 = vperm.xlu1 %711, %v60_v26  }
  0x47   :  { %623 = vperm.xlu0 %709, %v76_v27  }
  0x49   :  { %332 = vperm.xlu1 %711, %v62_v28  }
  0x4d   :  { %342 = vperm.xlu1 %711, %v64_v29  }
  0x51   :  { %352 = vperm.xlu1 %711, %v66_v30  }
  0x55   :  { %362 = vperm.xlu1 %711, %v68_v31  }
  0x59   :  { %372 = vperm.xlu1 %711, %v70_v32  }
  0x5d   :  { %382 = vperm.xlu1 %711, %v72_v33  }
  0x61   :  { %392 = vperm.xlu1 %711, %v74_v34  }
  0x81   :  { %v155_v36 = vpop.permute.xlu1 %154  ;;  %v163_v37 = vpop.permute.xlu0 %162 }
  0x82   :  { %v203_v62 = vmul.f32 %v875_v54, %v155_v36  ;;  %v204_v63 = vmul.f32 %v877_v55, %v155_v36  ;;  %v207_v25 = vmul.f32 %v875_v54, %v163_v37  ;;  %v208_v26 = vmul.f32 %v877_v55, %v163_v37 }
  0x85   :  { %v159_v39 = vpop.permute.xlu1 %158  ;;  %v868_v40 = vpop.permute.xlu0 %170 }
  0x86   :  { %v205_v3 = vmul.f32 %v875_v54, %v159_v39  ;;  %v206_v4 = vmul.f32 %v877_v55, %v159_v39 }
  0x89   :  { %v870_v43 = vpop.permute.xlu0 %178 }
  0x8a   :  { %v96_v47 = vpop.permute.xlu1 %95 }
  0x8b   :  { %v143_v27 = vmul.f32 %v879_v56, %v96_v47  ;;  %v144_v28 = vmul.f32 %v881_v57, %v96_v47 }
  0x8e   :  { %v81_v52 = vpop.permute.xlu0 %80 }
  0x8f   :  { %v167_v53 = vpop.permute.xlu1 %166  ;;  %v137_v59 = vmul.f32 %v879_v56, %v81_v52  ;;  %v138_v60 = vmul.f32 %v881_v57, %v81_v52 }
  0x90   :  { %v209_v21 = vmul.f32 %v875_v54, %v167_v53  ;;  %v210_v22 = vmul.f32 %v877_v55, %v167_v53 }
  0x91   :  { %v219_v6 = vadd.f32 %v203_v62, %v137_v59  ;;  %v220_v7 = vadd.f32 %v204_v63, %v138_v60  ;;  %v211_v62 = vmul.f32 %v875_v54, %v868_v40  ;;  %v212_v63 = vmul.f32 %v877_v55, %v868_v40 }
  0x92   :  { %v86_v58 = vpop.permute.xlu0 %85  ;;  %v225_v33 = vadd.f32 %v209_v21, %v143_v27  ;;  %v226_v34 = vadd.f32 %v210_v22, %v144_v28  ;;  %v215_v40 = vmul.f32 %v875_v54, %v870_v43 }
  0x93   :  { %v139_v0 = vmul.f32 %v879_v56, %v86_v58  ;;  %v140_v1 = vmul.f32 %v881_v57, %v86_v58 }
  0x94   :  { %v238_v61 = vpop.permute.xlu1 %237 }
  0x95   :  { %v275_v9 = vadd.f32 %v238_v61, %v219_v6  ;;  %v276_v10 = vadd.f32 %v238_v61, %v220_v7  ;;  %v221_v11 = vadd.f32 %v205_v3, %v139_v0  ;;  %v222_v12 = vadd.f32 %v206_v4, %v140_v1 }
  0x96   :  { %v91_v2 = vpop.permute.xlu0 %90 }
  0x97   :  { %v291_v17 = vmax.f32 %v275_v9, 0.0  ;;  %v292_v19 = vmax.f32 %v276_v10, 0.0  ;;  %v141_v29 = vmul.f32 %v879_v56, %v91_v2  ;;  %v142_v30 = vmul.f32 %v881_v57, %v91_v2 }
  0x98   :  { %v101_v8 = vpop.permute.xlu1 %100 }
  0x99   :  { %v223_v38 = vadd.f32 %v207_v25, %v141_v29  ;;  %v224_v39 = vadd.f32 %v208_v26, %v142_v30  ;;  %v145_v0 = vmul.f32 %v879_v56, %v101_v8  ;;  %v146_v1 = vmul.f32 %v881_v57, %v101_v8 }
  0x9a   :  { %v243_v13 = vpop.permute.xlu0 %242 }
  0x9b   :  { %v277_v14 = vadd.f32 %v243_v13, %v221_v11  ;;  %v278_v15 = vadd.f32 %v243_v13, %v222_v12  ;;  %v227_v7 = vadd.f32 %v211_v62, %v145_v0  ;;  %v228_v9 = vadd.f32 %v212_v63, %v146_v1 }
  0x9c   :  { %v106_v16 = vpop.permute.xlu1 %105 }
  0x9d   :  { %v293_v18 = vmax.f32 %v277_v14, 0.0  ;;  %v294_v20 = vmax.f32 %v278_v15, 0.0  ;;  %v147_v58 = vmul.f32 %v879_v56, %v106_v16  ;;  %v148_v59 = vmul.f32 %v881_v57, %v106_v16 }
  0x9e   :  { %v253_v32 = vpop.permute.xlu0 %252  ;;  %v216_v15 = vmul.f32 %v877_v55, %v870_v43 }
  0x9f   :  { %v308_v23 = vpack.c.bf16 %v294_v20, %v292_v19  ;;  %v307_v24 = vpack.c.bf16 %v293_v18, %v291_v17  ;;  %v281_v35 = vadd.f32 %v253_v32, %v225_v33  ;;  %v282_v36 = vadd.f32 %v253_v32, %v226_v34 }
  0xa1   :  { %v175_v31 = vpop.permute.xlu1 %174  ;;  %460 = vmatprep.subr.bf16.mxu0 %v308_v23  ;;  %v297_v44 = vmax.f32 %v281_v35, 0.0  ;;  %v298_v45 = vmax.f32 %v282_v36, 0.0 }
  0xa2   :  { %461 = vmatpush1.bf16.msra.mxu0 %v307_v24  ;;  %v213_v51 = vmul.f32 %v875_v54, %v175_v31  ;;  %v214_v52 = vmul.f32 %v877_v55, %v175_v31  ;;  %v263_v3 = vpop.permute.xlu0 %262 }
  0xa4   :  { %v229_v60 = vadd.f32 %v213_v51, %v147_v58  ;;  %v230_v61 = vadd.f32 %v214_v52, %v148_v59 }
  0xa6   :  { %v248_v41 = vpop.permute.xlu1 %247  ;;  %v285_v4 = vadd.f32 %v263_v3, %v229_v60  ;;  %v286_v6 = vadd.f32 %v263_v3, %v230_v61 }
  0xa7   :  { %v279_v37 = vadd.f32 %v248_v41, %v223_v38  ;;  %v280_v42 = vadd.f32 %v248_v41, %v224_v39  ;;  %v714_v39 = vld [vmem:[%s968_s3 + $0x10] sm:$0xff]   ;;  %v715_v41 = vld [vmem:[%s968_s3 + $0x18] sm:$0xff]  }
  0xa8   :  { %v301_v8 = vmax.f32 %v285_v4, 0.0  ;;  %v302_v16 = vmax.f32 %v286_v6, 0.0 }
  0xa9   :  { %v295_v46 = vmax.f32 %v279_v37, 0.0  ;;  %v296_v47 = vmax.f32 %v280_v42, 0.0  ;;  %v716_v37 = vld [vmem:[%s968_s3 + $0x20] sm:$0xff]   ;;  %v717_v42 = vld [vmem:[%s968_s3 + $0x28] sm:$0xff]  }
  0xaa   :  { %v111_v48 = vpop.permute.xlu1 %110 }
  0xab   :  { %v310_v49 = vpack.c.bf16 %v298_v45, %v296_v47  ;;  %v309_v50 = vpack.c.bf16 %v297_v44, %v295_v46  ;;  %v149_v10 = vmul.f32 %v879_v56, %v111_v48  ;;  %v150_v11 = vmul.f32 %v881_v57, %v111_v48  ;;  %v718_v44 = vld [vmem:[%s968_s3 + $0x30] sm:$0xff]   ;;  %v719_v45 = vld [vmem:[%s968_s3 + $0x38] sm:$0xff]   ;;  %v318_v46 = vpop.permute.xlu0 %317 }
  0xad   :  { %462 = vmatprep.subr.bf16.mxu0 %v310_v49  ;;  %v231_v22 = vadd.f32 %v215_v40, %v149_v10  ;;  %v232_v23 = vadd.f32 %v216_v15, %v150_v11 }
  0xae   :  { %v116_v53 = vpop.permute.xlu1 %115  ;;  %463 = vmatpush1.bf16.msra.mxu0 %v309_v50 }
  0xaf   :  { %v151_v24 = vmul.f32 %v879_v56, %v116_v53  ;;  %v152_v25 = vmul.f32 %v881_v57, %v116_v53  ;;  %v712_v56 = vld [vmem:[%s968_s3] sm:$0xff]   ;;  %v713_v57 = vld [vmem:[%s968_s3 + $0x8] sm:$0xff]   ;;  %v328_v0 = vpop.permute.xlu0 %327 }
  0xb3   :  { %v183_v2 = vpop.permute.xlu1 %182 }
  0xb4   :  { %v217_v17 = vmul.f32 %v875_v54, %v183_v2  ;;  %v218_v18 = vmul.f32 %v877_v55, %v183_v2 }
  0xb6   :  { %v233_v43 = vadd.f32 %v217_v17, %v151_v24  ;;  %v234_v30 = vadd.f32 %v218_v18, %v152_v25 }
  0xb8   :  { %v258_v12 = vpop.permute.xlu1 %257 }
  0xb9   :  { %v283_v13 = vadd.f32 %v258_v12, %v227_v7  ;;  %v284_v14 = vadd.f32 %v258_v12, %v228_v9 }
  0xbb   :  { %v299_v19 = vmax.f32 %v283_v13, 0.0  ;;  %v300_v20 = vmax.f32 %v284_v14, 0.0 }
  0xbc   :  { %v268_v21 = vpop.permute.xlu1 %267 }
  0xbd   :  { %v312_v26 = vpack.c.bf16 %v302_v16, %v300_v20  ;;  %v311_v27 = vpack.c.bf16 %v301_v8, %v299_v19  ;;  %v287_v28 = vadd.f32 %v268_v21, %v231_v22  ;;  %v288_v29 = vadd.f32 %v268_v21, %v232_v23  ;;  %v338_v16 = vpop.permute.xlu0 %337 }
  0xbf   :  { %464 = vmatprep.subr.bf16.mxu0 %v312_v26  ;;  %v303_v32 = vmax.f32 %v287_v28, 0.0  ;;  %v304_v33 = vmax.f32 %v288_v29, 0.0 }
  0xc0   :  { %v273_v31 = vpop.permute.xlu1 %272  ;;  %465 = vmatpush1.bf16.msra.mxu0 %v311_v27 }
  0xc1   :  { %v289_v54 = vadd.f32 %v273_v31, %v233_v43  ;;  %v290_v55 = vadd.f32 %v273_v31, %v234_v30  ;;  %v348_v31 = vpop.permute.xlu0 %347 }
  0xc3   :  { %v305_v34 = vmax.f32 %v289_v54, 0.0  ;;  %v306_v35 = vmax.f32 %v290_v55, 0.0 }
  0xc4   :  { %v323_v50 = vpop.permute.xlu1 %322 }
  0xc5   :  { %v314_v36 = vpack.c.bf16 %v306_v35, %v304_v33  ;;  %v313_v38 = vpack.c.bf16 %v305_v34, %v303_v32 }
  0xc7   :  { %466 = vmatprep.subr.bf16.mxu0 %v314_v36 }
  0xc8   :  { %467 = vmatpush1.bf16.msra.mxu0 %v313_v38  ;;  %v333_v6 = vpop.permute.xlu1 %332 }
  0xcb   :  { %691 = vmatmul.mubr.msk.bf16.vlgmr.msra.gmra.mrb[0].mxu0 %vm435_vm0, %v712_v56 }
  0xcc   :  { %502 = vmatprep.mubr.bf16.mxu0 %v721_v5  ;;  %v343_v21 = vpop.permute.xlu1 %342 }
  0xd0   :  { %v353_v34 = vpop.permute.xlu1 %352 }
  0xd3   :  { %692 = vmatmul.mubr.msk.bf16.gmra.mrb[4].mxu0 %vm435_vm0, %v713_v57 }
  0xd4   :  { %512 = vmatprep.mubr.bf16.mxu0 %v721_v5 }
  0xdb   :  { %693 = vmatmul.mubr.msk.bf16.gmra.mrb[8].mxu0 %vm435_vm0, %v714_v39 }
  0xdc   :  { %522 = vmatprep.mubr.bf16.mxu0 %v721_v5 }
  0xe3   :  { %694 = vmatmul.mubr.msk.bf16.gmra.mrb[12].mxu0 %vm435_vm0, %v715_v41 }
  0xe4   :  { %532 = vmatprep.mubr.bf16.mxu0 %v721_v5 }
  0xeb   :  { %695 = vmatmul.mubr.msk.bf16.gmra.mrb[16].mxu0 %vm435_vm0, %v716_v37 }
  0xec   :  { %542 = vmatprep.mubr.bf16.mxu0 %v721_v5 }
  0xf3   :  { %696 = vmatmul.mubr.msk.bf16.gmra.mrb[20].mxu0 %vm435_vm0, %v717_v42 }
  0xf4   :  { %552 = vmatprep.mubr.bf16.mxu0 %v721_v5 }
  0xfb   :  { %697 = vmatmul.mubr.msk.bf16.gmra.mrb[24].mxu0 %vm435_vm0, %v718_v44 }
  0xfc   :  { %562 = vmatprep.mubr.bf16.mxu0 %v721_v5 }
 0x103   :  { %698 = vmatmul.mubr.msk.bf16.gmra.mrb[28].mxu0 %vm435_vm0, %v719_v45  ;;  %v358_v45 = vpop.permute.xlu0 %357 }
 0x19e   :  { %v494_v47 = vpop.f32.mrb[0].mxu0 }
 0x19f   :  { %v495_v48 = vadd.f32 %v494_v47, %v318_v46  ;;  %v496_v49 = vpop.f32.mrb[1].mxu0 }
 0x1a0   :  { %v497_v51 = vadd.f32 %v496_v49, %v318_v46  ;;  %v498_v52 = vpop.f32.mrb[2].mxu0 }
 0x1a1   :  { %v499_v53 = vadd.f32 %v498_v52, %v323_v50  ;;  %v500_v58 = vpop.f32.mrb[3].mxu0  ;;  %v573_v60 = vmax.f32 %v495_v48, 0.0 }
 0x1a2   :  { %v501_v59 = vadd.f32 %v500_v58, %v323_v50  ;;  %v574_v62 = vmax.f32 %v497_v51, 0.0  ;;  %v363_v50 = vpop.permute.xlu1 %362 }
 0x1a3   :  { %v575_v61 = vmax.f32 %v499_v53, 0.0 }
 0x1a4   :  { %v576_v5 = vmax.f32 %v501_v59, 0.0 }
 0x1a5   :  { %v605_v63 = vpack.c.bf16 %v575_v61, %v573_v60 }
 0x1a6   :  { %v504_v1 = vpop.f32.mrb[4].mxu0  ;;  %v606_v2 = vpack.c.bf16 %v576_v5, %v574_v62 }
 0x1a7   :  { %v505_v3 = vadd.f32 %v504_v1, %v328_v0  ;;  %v506_v4 = vpop.f32.mrb[5].mxu0 }
 0x1a8   :  { %v507_v7 = vadd.f32 %v506_v4, %v328_v0  ;;  %v508_v9 = vpop.f32.mrb[6].mxu0  ;;  %626 = vmatprep.subr.bf16.mxu1 %v606_v2  ;;  %v368_v0 = vpop.permute.xlu0 %367 }
 0x1a9   :  { %v509_v10 = vadd.f32 %v508_v9, %v333_v6  ;;  %v510_v11 = vpop.f32.mrb[7].mxu0  ;;  %627 = vmatpush1.bf16.msra.mxu1 %v605_v63  ;;  %v577_v13 = vmax.f32 %v505_v3, 0.0 }
 0x1aa   :  { %v511_v12 = vadd.f32 %v510_v11, %v333_v6  ;;  %v578_v40 = vmax.f32 %v507_v7, 0.0  ;;  %v373_v6 = vpop.permute.xlu1 %372 }
 0x1ab   :  { %v579_v14 = vmax.f32 %v509_v10, 0.0 }
 0x1ac   :  { %v580_v15 = vmax.f32 %v511_v12, 0.0 }
 0x1ad   :  { %v607_v8 = vpack.c.bf16 %v579_v14, %v577_v13 }
 0x1ae   :  { %v608_v17 = vpack.c.bf16 %v580_v15, %v578_v40  ;;  %v514_v18 = vpop.f32.mrb[8].mxu0 }
 0x1af   :  { %v515_v19 = vadd.f32 %v514_v18, %v338_v16  ;;  %v516_v20 = vpop.f32.mrb[9].mxu0 }
 0x1b0   :  { %v517_v22 = vadd.f32 %v516_v20, %v338_v16  ;;  %v518_v23 = vpop.f32.mrb[10].mxu0  ;;  %628 = vmatprep.subr.bf16.mxu1 %v608_v17  ;;  %v378_v16 = vpop.permute.xlu0 %377 }
 0x1b1   :  { %v519_v24 = vadd.f32 %v518_v23, %v343_v21  ;;  %v520_v25 = vpop.f32.mrb[11].mxu0  ;;  %629 = vmatpush1.bf16.msra.mxu1 %v607_v8  ;;  %v581_v27 = vmax.f32 %v515_v19, 0.0 }
 0x1b2   :  { %v521_v26 = vadd.f32 %v520_v25, %v343_v21  ;;  %v582_v29 = vmax.f32 %v517_v22, 0.0  ;;  %v383_v21 = vpop.permute.xlu1 %382 }
 0x1b3   :  { %v583_v28 = vmax.f32 %v519_v24, 0.0 }
 0x1b4   :  { %v584_v43 = vmax.f32 %v521_v26, 0.0 }
 0x1b5   :  { %v609_v30 = vpack.c.bf16 %v583_v28, %v581_v27 }
 0x1b6   :  { %v610_v54 = vpack.c.bf16 %v584_v43, %v582_v29  ;;  %v524_v55 = vpop.f32.mrb[12].mxu0 }
 0x1b7   :  { %v525_v32 = vadd.f32 %v524_v55, %v348_v31  ;;  %v526_v33 = vpop.f32.mrb[13].mxu0 }
 0x1b8   :  { %v527_v35 = vadd.f32 %v526_v33, %v348_v31  ;;  %v528_v36 = vpop.f32.mrb[14].mxu0  ;;  %630 = vmatprep.subr.bf16.mxu1 %v610_v54  ;;  %v388_v31 = vpop.permute.xlu0 %387 }
 0x1b9   :  { %v529_v38 = vadd.f32 %v528_v36, %v353_v34  ;;  %v530_v56 = vpop.f32.mrb[15].mxu0  ;;  %631 = vmatpush1.bf16.msra.mxu1 %v609_v30  ;;  %v585_v39 = vmax.f32 %v525_v32, 0.0 }
 0x1ba   :  { %v531_v57 = vadd.f32 %v530_v56, %v353_v34  ;;  %v586_v37 = vmax.f32 %v527_v35, 0.0  ;;  %v393_v34 = vpop.permute.xlu1 %392 }
 0x1bb   :  { %v587_v41 = vmax.f32 %v529_v38, 0.0 }
 0x1bc   :  { %v588_v42 = vmax.f32 %v531_v57, 0.0 }
 0x1bd   :  { %v611_v44 = vpack.c.bf16 %v587_v41, %v585_v39 }
 0x1be   :  { %v612_v46 = vpack.c.bf16 %v588_v42, %v586_v37  ;;  %v534_v47 = vpop.f32.mrb[16].mxu0 }
 0x1bf   :  { %v535_v48 = vadd.f32 %v534_v47, %v358_v45  ;;  %v536_v49 = vpop.f32.mrb[17].mxu0  ;;  %v624_v47 = vpop.permute.xlu0 %623 }
 0x1c0   :  { %v537_v51 = vadd.f32 %v536_v49, %v358_v45  ;;  %v538_v52 = vpop.f32.mrb[18].mxu0  ;;  %632 = vmatprep.subr.bf16.mxu1 %v612_v46  ;;  %v75_v46 = vld [vmem:[%s970_s5] sm:$0x1] }
 0x1c1   :  { %v539_v53 = vadd.f32 %v538_v52, %v363_v50  ;;  %v540_v58 = vpop.f32.mrb[19].mxu0  ;;  %633 = vmatpush1.bf16.msra.mxu1 %v611_v44  ;;  %v589_v60 = vmax.f32 %v535_v48, 0.0 }
 0x1c2   :  { %v541_v59 = vadd.f32 %v540_v58, %v363_v50  ;;  %v590_v62 = vmax.f32 %v537_v51, 0.0 }
 0x1c3   :  { %v591_v61 = vmax.f32 %v539_v53, 0.0 }
 0x1c4   :  { %v592_v5 = vmax.f32 %v541_v59, 0.0 }
 0x1c5   :  { %v613_v63 = vpack.c.bf16 %v591_v61, %v589_v60 }
 0x1c6   :  { %v614_v1 = vpack.c.bf16 %v592_v5, %v590_v62  ;;  %v544_v2 = vpop.f32.mrb[20].mxu0 }
 0x1c7   :  { %v545_v3 = vadd.f32 %v544_v2, %v368_v0  ;;  %v546_v4 = vpop.f32.mrb[21].mxu0 }
 0x1c8   :  { %v547_v7 = vadd.f32 %v546_v4, %v368_v0  ;;  %v548_v9 = vpop.f32.mrb[22].mxu0  ;;  %634 = vmatprep.subr.bf16.mxu1 %v614_v1 }
 0x1c9   :  { %v549_v10 = vadd.f32 %v548_v9, %v373_v6  ;;  %v550_v11 = vpop.f32.mrb[23].mxu0  ;;  %635 = vmatpush1.bf16.msra.mxu1 %v613_v63  ;;  %v593_v13 = vmax.f32 %v545_v3, 0.0 }
 0x1ca   :  { %v551_v12 = vadd.f32 %v550_v11, %v373_v6  ;;  %v594_v40 = vmax.f32 %v547_v7, 0.0 }
 0x1cb   :  { %v595_v14 = vmax.f32 %v549_v10, 0.0 }
 0x1cc   :  { %v596_v15 = vmax.f32 %v551_v12, 0.0 }
 0x1cd   :  { %v615_v8 = vpack.c.bf16 %v595_v14, %v593_v13 }
 0x1ce   :  { %v616_v17 = vpack.c.bf16 %v596_v15, %v594_v40  ;;  %v554_v18 = vpop.f32.mrb[24].mxu0 }
 0x1cf   :  { %v555_v19 = vadd.f32 %v554_v18, %v378_v16  ;;  %v556_v20 = vpop.f32.mrb[25].mxu0 }
 0x1d0   :  { %v557_v22 = vadd.f32 %v556_v20, %v378_v16  ;;  %v558_v23 = vpop.f32.mrb[26].mxu0  ;;  %636 = vmatprep.subr.bf16.mxu1 %v616_v17 }
 0x1d1   :  { %v559_v24 = vadd.f32 %v558_v23, %v383_v21  ;;  %v560_v25 = vpop.f32.mrb[27].mxu0  ;;  %637 = vmatpush1.bf16.msra.mxu1 %v615_v8  ;;  %v597_v27 = vmax.f32 %v555_v19, 0.0 }
 0x1d2   :  { %v561_v26 = vadd.f32 %v560_v25, %v383_v21  ;;  %v598_v29 = vmax.f32 %v557_v22, 0.0 }
 0x1d3   :  { %v599_v28 = vmax.f32 %v559_v24, 0.0 }
 0x1d4   :  { %v600_v43 = vmax.f32 %v561_v26, 0.0 }
 0x1d5   :  { %v617_v30 = vpack.c.bf16 %v599_v28, %v597_v27 }
 0x1d6   :  { %v618_v54 = vpack.c.bf16 %v600_v43, %v598_v29  ;;  %v564_v55 = vpop.f32.mrb[28].mxu0 }
 0x1d7   :  { %v565_v32 = vadd.f32 %v564_v55, %v388_v31  ;;  %v566_v33 = vpop.f32.mrb[29].mxu0 }
 0x1d8   :  { %v567_v35 = vadd.f32 %v566_v33, %v388_v31  ;;  %v568_v36 = vpop.f32.mrb[30].mxu0  ;;  %638 = vmatprep.subr.bf16.mxu1 %v618_v54 }
 0x1d9   :  { %v569_v38 = vadd.f32 %v568_v36, %v393_v34  ;;  %v570_v56 = vpop.f32.mrb[31].mxu0  ;;  %639 = vmatpush1.bf16.msra.mxu1 %v617_v30  ;;  %v601_v39 = vmax.f32 %v565_v32, 0.0 }
 0x1da   :  { %v571_v57 = vadd.f32 %v570_v56, %v393_v34  ;;  %v602_v37 = vmax.f32 %v567_v35, 0.0 }
 0x1db   :  { %v603_v41 = vmax.f32 %v569_v38, 0.0 }
 0x1dc   :  { %v604_v42 = vmax.f32 %v571_v57, 0.0 }
 0x1dd   :  { %v619_v44 = vpack.c.bf16 %v603_v41, %v601_v39 }
 0x1de   :  { %v620_v45 = vpack.c.bf16 %v604_v42, %v602_v37 }
 0x1e0   :  { %640 = vmatprep.subr.bf16.mxu1 %v620_v45 }
 0x1e1   :  { %641 = vmatpush1.bf16.msra.mxu1 %v619_v44 }
 0x1e4   :  { %659 = vmatmul.mubr.bf16.vlgmr.msra.gmra.mrb[0].mxu1 %v75_v46 }
 0x2b7   :  { %v660_v48 = vpop.f32.mrb[0].mxu1 }
 0x2b8   :  { %v661_v49 = vadd.f32 %v660_v48, %v624_v47  ;;  %v662_v50 = vpop.f32.mrb[1].mxu1 }
 0x2b9   :  { %v663_v51 = vadd.f32 %v662_v50, %v624_v47  ;;  %v664_v52 = vpop.f32.mrb[2].mxu1 }
 0x2ba   :  { %v665_v53 = vpop.f32.mrb[3].mxu1 }
 0x2bb   :  { %v669_v58 = vcombine.low %v661_v49, %v663_v51 }
 0x2bd   :  { %699 = vst.sshfl [vmem:[%s971_s7] sm:$0x33 pattern:$0x76325410] %v669_v58 }

</bundles_post_ra>
